<compile_context>
chip_gen: v6e
topology: v6e:2x2x1
jax: 0.10.0
libtpu: 0.0.40
codegen_flags: <defaults>
</compile_context>

<pallas_src>
import functools

import jax
import jax.numpy as jnp
from jax.experimental import pallas as pl
from jax.experimental.pallas import tpu as pltpu


def _actor_kernel(x_ref, w1_ref, w2_ref, w34_ref, b_ref, out_ref,
                  *, log_std_min, log_std_max):
    H = w1_ref.shape[1]
    two_a = w34_ref.shape[1]
    A = two_a // 2

    x = x_ref[...]                                                  # (TB, S) f32

    h = jnp.dot(x, w1_ref[...], preferred_element_type=jnp.float32)
    h = jnp.maximum(h + b_ref[0:1, 0:H], 0.0)                       # (TB, H)

    h = jnp.dot(h, w2_ref[...], preferred_element_type=jnp.float32)
    h = jnp.maximum(h + b_ref[1:2, 0:H], 0.0)                       # (TB, H)

    out = jnp.dot(h, w34_ref[...], preferred_element_type=jnp.float32)
    out = out + b_ref[2:3, 0:two_a]                                 # (TB, 2A) = [mu | log_std]

    # Lanes [0, A) hold mu; lanes [A, 2A) hold log_std -> clamp + exp.
    # Use an iota mask instead of lane slicing/concat to keep everything
    # vreg-parallel (exp uses the EUP slot; select/clip use the VPU).
    col = jax.lax.broadcasted_iota(jnp.int32, out.shape, 1)
    std = jnp.exp(jnp.clip(out, log_std_min, log_std_max))
    out_ref[...] = jnp.where(col >= A, std, out).astype(out_ref.dtype)


def pack_actor_params(params):
    """One-time packing (do NOT call per forward step).

    params: dict fc1..fc4, each {'w': (out,in) torch layout, 'b': (out,)}.
    Returns (w1, w2, w34, bias_pack) with weights transposed to (in,out),
    fc3/fc4 fused along the output axis, and all biases in one (3, BW) array.
    """
    w1 = params["fc1"]["w"].T.astype(jnp.float32)                   # (S, H)
    w2 = params["fc2"]["w"].T.astype(jnp.float32)                   # (H, H)
    w34 = jnp.concatenate([params["fc3"]["w"].T,
                           params["fc4"]["w"].T], axis=1).astype(jnp.float32)  # (H, 2A)
    H = w1.shape[1]
    two_a = w34.shape[1]
    bw = max(H, two_a)
    bias = jnp.zeros((3, bw), jnp.float32)
    bias = bias.at[0, :H].set(params["fc1"]["b"].astype(jnp.float32))
    bias = bias.at[1, :H].set(params["fc2"]["b"].astype(jnp.float32))
    b34 = jnp.concatenate([params["fc3"]["b"],
                           params["fc4"]["b"]]).astype(jnp.float32)
    bias = bias.at[2, :two_a].set(b34)
    return (w1, w2, w34, bias)


def actor_forward(x, packed, log_std_min=-20.0, log_std_max=2.0):
    """Pallas implementation of Actor.forward.

    x:      (B, state_size) float32
    packed: output of pack_actor_params
    Returns (mu, std), each (B, action_size) float32.
    """
    w1, w2, w34, bias = packed
    x = x.astype(jnp.float32)
    B, S = x.shape
    two_a = w34.shape[1]
    A = two_a // 2

    # Batch tiling: sublane-align small batches; tile large batches on a
    # "parallel" 1-D grid (weights stay resident in VMEM across steps).
    if B <= 512:
        TB = pl.cdiv(B, 8) * 8
    else:
        TB = 512
    Bp = pl.cdiv(B, TB) * TB
    if Bp != B:
        x = jnp.pad(x, ((0, Bp - B), (0, 0)))

    kernel = functools.partial(_actor_kernel,
                               log_std_min=float(log_std_min),
                               log_std_max=float(log_std_max))

    out = pl.pallas_call(
        kernel,
        out_shape=jax.ShapeDtypeStruct((Bp, two_a), jnp.float32),
        grid=(Bp // TB,),
        in_specs=[
            pl.BlockSpec((TB, S), lambda i: (i, 0)),            # x: tiled over batch
            pl.BlockSpec(w1.shape, lambda i: (0, 0)),           # weights: resident
            pl.BlockSpec(w2.shape, lambda i: (0, 0)),
            pl.BlockSpec(w34.shape, lambda i: (0, 0)),
            pl.BlockSpec(bias.shape, lambda i: (0, 0)),
        ],
        out_specs=pl.BlockSpec((TB, two_a), lambda i: (i, 0)),
        compiler_params=pltpu.CompilerParams(
            dimension_semantics=("parallel",)),
    )(x, w1, w2, w34, bias)

    mu = out[:B, :A]
    std = out[:B, A:]
    return mu, std


def init_params(key, state_size, action_size, hidden_size):
    """Deterministic PyTorch-style uniform(-1/sqrt(fan_in), 1/sqrt(fan_in)) init."""
    dims = {
        "fc1": (hidden_size, state_size),
        "fc2": (hidden_size, hidden_size),
        "fc3": (action_size, hidden_size),
        "fc4": (action_size, hidden_size),
    }
    params = {}
    for i, (name, (out_f, in_f)) in enumerate(dims.items()):
        kw, kb = jax.random.split(jax.random.fold_in(key, i))
        bound = 1.0 / (in_f ** 0.5)
        params[name] = {
            "w": jax.random.uniform(kw, (out_f, in_f), jnp.float32, -bound, bound),
            "b": jax.random.uniform(kb, (out_f,), jnp.float32, -bound, bound),
        }
    return params


def actor_ref(x, params, log_std_min=-20.0, log_std_max=2.0):
    """Pure-JAX reference mirroring the PyTorch forward (for verification)."""
    def lin(h, p):
        return h @ p["w"].T + p["b"]
    h = jax.nn.relu(lin(x, params["fc1"]))
    h = jax.nn.relu(lin(h, params["fc2"]))
    mu = lin(h, params["fc3"])
    log_std = jnp.clip(lin(h, params["fc4"]), log_std_min, log_std_max)
    return mu, jnp.exp(log_std)


if __name__ == "__main__":
    key = jax.random.PRNGKey(0)
    batch, state_size, action_size, hidden_size = 4, 12, 4, 32

    k_x, k_p = jax.random.split(key)
    x = jax.random.normal(k_x, (batch, state_size), jnp.float32)
    params = init_params(k_p, state_size, action_size, hidden_size)

    # One-time packing (outside the per-call hot path), jitted forward.
    packed = jax.tree_util.tree_map(jax.block_until_ready, pack_actor_params(params))
    fwd = jax.jit(lambda x_, p_: actor_forward(x_, p_))

    mu, std = fwd(x, packed)
    mu = jax.block_until_ready(mu)
    std = jax.block_until_ready(std)

    mu_ref, std_ref = actor_ref(x, params)
    assert mu.shape == (batch, action_size) and std.shape == (batch, action_size)
    assert jnp.allclose(mu, mu_ref, atol=1e-5), "mu mismatch vs reference"
    assert jnp.allclose(std, std_ref, atol=1e-5), "std mismatch vs reference"

    print("KERNEL_OK")
</pallas_src>

<mosaic_0001>
module attributes {stable_mosaic.version = 11 : i64} {
  func.func @_actor_kernel(%arg0: i32, %arg1: memref<8x12xf32, #tpu.memory_space<vmem>>, %arg2: memref<12x32xf32, #tpu.memory_space<vmem>>, %arg3: memref<32x32xf32, #tpu.memory_space<vmem>>, %arg4: memref<32x8xf32, #tpu.memory_space<vmem>>, %arg5: memref<3x32xf32, #tpu.memory_space<vmem>>, %arg6: memref<8x8xf32, #tpu.memory_space<vmem>>) attributes {dimension_semantics = [#tpu.dimension_semantics<parallel>], iteration_bounds = array<i64: 1>, scalar_prefetch = 0 : i64, scratch_operands = 0 : i64, tpu.core_type = #tpu.core_type<tc>, window_params = [{transform_indices = @transform_0, window_bounds = array<i64: 8, 12>}, {pipeline_mode = #tpu.pipeline_mode<synchronous>, transform_indices = @transform_1, window_bounds = array<i64: 12, 32>}, {pipeline_mode = #tpu.pipeline_mode<synchronous>, transform_indices = @transform_2, window_bounds = array<i64: 32, 32>}, {pipeline_mode = #tpu.pipeline_mode<synchronous>, transform_indices = @transform_3, window_bounds = array<i64: 32, 8>}, {pipeline_mode = #tpu.pipeline_mode<synchronous>, transform_indices = @transform_4, window_bounds = array<i64: 3, 32>}, {transform_indices = @transform_5, window_bounds = array<i64: 8, 8>}]} {
    %c0 = arith.constant 0 : index
    %c0_0 = arith.constant 0 : index
    %0 = vector.load %arg1[%c0, %c0_0] : memref<8x12xf32, #tpu.memory_space<vmem>>, vector<8x12xf32>
    %c0_1 = arith.constant 0 : index
    %c0_2 = arith.constant 0 : index
    %1 = vector.load %arg2[%c0_1, %c0_2] : memref<12x32xf32, #tpu.memory_space<vmem>>, vector<12x32xf32>
    %cst = arith.constant dense<0.000000e+00> : vector<8x32xf32>
    %2 = tpu.matmul %0, %1, %cst {dimension_numbers = #tpu.dot_dimension_numbers<[1], [0], [0], [1], [0, 0, 1, 1], [], []>} : vector<8x12xf32>, vector<12x32xf32>, vector<8x32xf32> -> vector<8x32xf32>
    %c0_3 = arith.constant 0 : index
    %c0_4 = arith.constant 0 : index
    %3 = vector.load %arg5[%c0_3, %c0_4] : memref<3x32xf32, #tpu.memory_space<vmem>>, vector<1x32xf32>
    %4 = vector.broadcast %3 : vector<1x32xf32> to vector<8x32xf32>
    %5 = arith.addf %2, %4 : vector<8x32xf32>
    %cst_5 = arith.constant 0.000000e+00 : f32
    %6 = vector.broadcast %cst_5 : f32 to vector<8x32xf32>
    %7 = arith.maximumf %5, %6 : vector<8x32xf32>
    %c0_6 = arith.constant 0 : index
    %c0_7 = arith.constant 0 : index
    %8 = vector.load %arg3[%c0_6, %c0_7] : memref<32x32xf32, #tpu.memory_space<vmem>>, vector<32x32xf32>
    %cst_8 = arith.constant dense<0.000000e+00> : vector<8x32xf32>
    %9 = tpu.matmul %7, %8, %cst_8 {dimension_numbers = #tpu.dot_dimension_numbers<[1], [0], [0], [1], [0, 0, 1, 1], [], []>} : vector<8x32xf32>, vector<32x32xf32>, vector<8x32xf32> -> vector<8x32xf32>
    %c1 = arith.constant 1 : index
    %c0_9 = arith.constant 0 : index
    %10 = vector.load %arg5[%c1, %c0_9] : memref<3x32xf32, #tpu.memory_space<vmem>>, vector<1x32xf32>
    %11 = vector.broadcast %10 : vector<1x32xf32> to vector<8x32xf32>
    %12 = arith.addf %9, %11 : vector<8x32xf32>
    %cst_10 = arith.constant 0.000000e+00 : f32
    %13 = vector.broadcast %cst_10 : f32 to vector<8x32xf32>
    %14 = arith.maximumf %12, %13 : vector<8x32xf32>
    %c0_11 = arith.constant 0 : index
    %c0_12 = arith.constant 0 : index
    %15 = vector.load %arg4[%c0_11, %c0_12] : memref<32x8xf32, #tpu.memory_space<vmem>>, vector<32x8xf32>
    %cst_13 = arith.constant dense<0.000000e+00> : vector<8x8xf32>
    %16 = tpu.matmul %14, %15, %cst_13 {dimension_numbers = #tpu.dot_dimension_numbers<[1], [0], [0], [1], [0, 0, 1, 1], [], []>} : vector<8x32xf32>, vector<32x8xf32>, vector<8x8xf32> -> vector<8x8xf32>
    %c2 = arith.constant 2 : index
    %c0_14 = arith.constant 0 : index
    %17 = vector.load %arg5[%c2, %c0_14] : memref<3x32xf32, #tpu.memory_space<vmem>>, vector<1x8xf32>
    %18 = vector.broadcast %17 : vector<1x8xf32> to vector<8x8xf32>
    %19 = arith.addf %16, %18 : vector<8x8xf32>
    %20 = tpu.iota {dimensions = array<i32: 1>} : vector<8x8xi32>
    %cst_15 = arith.constant -2.000000e+01 : f32
    %cst_16 = arith.constant 2.000000e+00 : f32
    %21 = vector.broadcast %cst_15 : f32 to vector<8x8xf32>
    %22 = arith.maximumf %21, %19 : vector<8x8xf32>
    %23 = vector.broadcast %cst_16 : f32 to vector<8x8xf32>
    %24 = arith.minimumf %23, %22 : vector<8x8xf32>
    %25 = math.exp %24 : vector<8x8xf32>
    %c4_i32 = arith.constant 4 : i32
    %26 = vector.broadcast %c4_i32 : i32 to vector<8x8xi32>
    %27 = arith.cmpi sge, %20, %26 : vector<8x8xi32>
    %28 = arith.select %27, %25, %19 : vector<8x8xi1>, vector<8x8xf32>
    %c0_17 = arith.constant 0 : index
    %c0_18 = arith.constant 0 : index
    %29 = vector.load %arg6[%c0_17, %c0_18] : memref<8x8xf32, #tpu.memory_space<vmem>>, vector<8x8xf32>
    tpu.vector_store %arg6[%c0_17, %c0_18], %28 {strides = array<i32>} : memref<8x8xf32, #tpu.memory_space<vmem>>, vector<8x8xf32>,
    return
  }
  func.func @transform_0(%arg0: i32) -> (i32, i32) {
    %c0_i32 = arith.constant 0 : i32
    %c0_i32_0 = arith.constant 0 : i32
    return %arg0, %c0_i32 : i32, i32
  }
  func.func @transform_1(%arg0: i32) -> (i32, i32) {
    %c0_i32 = arith.constant 0 : i32
    %c0_i32_0 = arith.constant 0 : i32
    %c0_i32_1 = arith.constant 0 : i32
    return %c0_i32, %c0_i32_0 : i32, i32
  }
  func.func @transform_2(%arg0: i32) -> (i32, i32) {
    %c0_i32 = arith.constant 0 : i32
    %c0_i32_0 = arith.constant 0 : i32
    %c0_i32_1 = arith.constant 0 : i32
    return %c0_i32, %c0_i32_0 : i32, i32
  }
  func.func @transform_3(%arg0: i32) -> (i32, i32) {
    %c0_i32 = arith.constant 0 : i32
    %c0_i32_0 = arith.constant 0 : i32
    %c0_i32_1 = arith.constant 0 : i32
    return %c0_i32, %c0_i32_0 : i32, i32
  }
  func.func @transform_4(%arg0: i32) -> (i32, i32) {
    %c0_i32 = arith.constant 0 : i32
    %c0_i32_0 = arith.constant 0 : i32
    %c0_i32_1 = arith.constant 0 : i32
    return %c0_i32, %c0_i32_0 : i32, i32
  }
  func.func @transform_5(%arg0: i32) -> (i32, i32) {
    %c0_i32 = arith.constant 0 : i32
    %c0_i32_0 = arith.constant 0 : i32
    return %arg0, %c0_i32 : i32, i32
  }
}

</mosaic_0001>

<bundles_post_ra>
// kernel: _lambda_.1
= control target key start
LH: loop header
LB: loop body
LE: loop exit
PB: predicated region body
PF: predicated region fallthrough
CT: control target
= control target key end

     0   :  { %vm32_vm0 = vcmask 1043456   ;;  %v340_v0 = vmov 0.0   ;;  %vm341_vm1 = vmmov 0   ;;  %vm28_vm2 = vcmask 97280   ;;  %s419_s1 = inlined_call_operand.vmem [shape: f32[12,32], index: 1, kind: input, shape index: {}]   ;;  %s420_s0 = inlined_call_operand.vmem [shape: f32[8,12], index: 0, kind: input, shape index: {}]   ;;  %s421_s2 = inlined_call_operand.vmem [shape: f32[32,32], index: 2, kind: input, shape index: {}]   ;;  %s422_s3 = inlined_call_operand.vmem [shape: f32[32,8], index: 3, kind: input, shape index: {}]   ;;  %s423_s4 = inlined_call_operand.vmem [shape: f32[3,32], index: 4, kind: input, shape index: {}]   ;;  %s424_s5 = inlined_call_operand.vmem [shape: f32[8,8], index: 5, kind: output, shape index: {}]  }
   0x1   :  { %307 = vmatprep.subr.mxu0 %v340_v0  ;;  %v22_v1 = vld [vmem:[%s419_s1 + $0x8] sm:$0xf]  ;;  %v21_v2 = vld [vmem:[%s419_s1] sm:$0xff]  ;;  %311 = vmatprep.mubr.msk.f32.mxu0 %vm341_vm1, %v340_v0  ;;  %v110_v4 = vld [vmem:[%s421_s2 + $0x18] sm:$0xff]  ;;  %vm116_vm3 = vcmask 261120   ;;  %v273_v29 = vlaneseq  ;;  %vm281_vm5 = vcmask 64512  }
   0x2   :  { %308 = vmatpush3.msk.msra.mxu0 %vm32_vm0, %v22_v1  ;;  %v20_v3 = vld [vmem:[%s420_s0] sm:$0xff]  ;;  %314 = vmatprep.subr.mxu1 %v340_v0  ;;  %v109_v5 = vld [vmem:[%s421_s2 + $0x10] sm:$0xff]  ;;  %v108_v6 = vld [vmem:[%s421_s2 + $0x8] sm:$0xff] }
   0x3   :  { %309 = vmatprep.subr.mxu0 %v340_v0  ;;  %315 = vmatpush3.msra.mxu1 %v110_v4  ;;  %v107_v7 = vld [vmem:[%s421_s2] sm:$0xff]  ;;  %v194_v8 = vld [vmem:[%s422_s3 + $0x18] sm:$0xff]  ;;  %v193_v14 = vld [vmem:[%s422_s3 + $0x10] sm:$0xff]  ;;  %v274_v30 = vand.u32 127, %v273_v29 }
   0x4   :  { %310 = vmatpush3.msra.mxu0 %v21_v2  ;;  %316 = vmatprep.subr.mxu1 %v340_v0  ;;  %v287_v9 = vld [vmem:[%s423_s4] ss:$0 sm:$0xff]  ;;  %v192_v15 = vld [vmem:[%s422_s3 + $0x8] sm:$0xff]  ;;  %v290_v17 = vld [vmem:[%s423_s4 + $0x1] ss:$0 sm:$0xff] }
   0x5   :  { %312 = vmatmul.mubr.msk.f32.vlgmr.msra.gmra.mxu0 %vm28_vm2, %v20_v3  ;;  %322 = vmatprep.mubr.msk.f32.mxu1 %vm341_vm1, %v340_v0  ;;  %v191_v16 = vld [vmem:[%s422_s3] sm:$0xff]  ;;  %vm279_vm4 = vcmp.ge.s32.totalorder %v274_v30, 4 }
   0x6   :  { %325 = vmatprep.subr.mxu0 %v340_v0  ;;  %333 = vmatprep.mubr.msk.f32.mxu0 %vm341_vm1, %v340_v0  ;;  %v292_v22 = vld [vmem:[%s423_s4 + $0x2] ss:$0 sm:$0xff] }
   0x7   :  { %317 = vmatpush3.msra.mxu1 %v109_v5  ;;  %326 = vmatpush3.msra.mxu0 %v194_v8 }
   0x8   :  { %318 = vmatprep.subr.mxu1 %v340_v0  ;;  %327 = vmatprep.subr.mxu0 %v340_v0 }
   0x9   :  { %319 = vmatpush3.msra.mxu1 %v108_v6  ;;  %328 = vmatpush3.msra.mxu0 %v193_v14 }
   0xa   :  { %320 = vmatprep.subr.mxu1 %v340_v0  ;;  %329 = vmatprep.subr.mxu0 %v340_v0 }
   0xb   :  { %321 = vmatpush3.msra.mxu1 %v107_v7  ;;  %330 = vmatpush3.msra.mxu0 %v192_v15 }
   0xc   :  { %331 = vmatprep.subr.mxu0 %v340_v0 }
   0xd   :  { %332 = vmatpush3.msra.mxu0 %v191_v16 }
  0xc5   :  { %v102_v10 = vpop.f32.mrf.mxu0 }
  0xc6   :  { %v103_v11 = vadd.f32 %v287_v9, %v102_v10 }
  0xc7   :  { %v313_v12 = vpop.f32.mrf.mxu0 }
  0xc8   :  { %v106_v13 = vmax.f32 %v103_v11, 0.0 }
  0xca   :  { %323 = vmatmul.mubr.msk.f32.vlgmr.msra.gmra.mxu1 %vm116_vm3, %v106_v13 }
 0x18a   :  { %v186_v18 = vpop.f32.mrf.mxu1 }
 0x18b   :  { %v187_v19 = vadd.f32 %v290_v17, %v186_v18 }
 0x18c   :  { %v324_v20 = vpop.f32.mrf.mxu1 }
 0x18d   :  { %v190_v21 = vmax.f32 %v187_v19, 0.0 }
 0x18f   :  { %334 = vmatmul.mubr.msk.f32.vlgmr.msra.gmra.mxu0 %vm116_vm3, %v190_v21 }
 0x24f   :  { %v269_v23 = vpop.f32.mrf.mxu0 }
 0x250   :  { %v270_v24 = vadd.f32 %v292_v22, %v269_v23 }
 0x251   :  { %v335_v25 = vpop.f32.mrf.mxu0 }
 0x252   :  { %v275_v26 = vmax.f32 %v270_v24, -20.0 }
 0x254   :  { %v276_v27 = vmin.f32 %v275_v26, 2.0 }
 0x256   :  { %v277_v28 = vmul.f32 1.442695, %v276_v27 }
 0x258   :  { %338 = vpow2.f32 %v277_v28 }
 0x265   :  { %v339_v31 = vpop.eup %338 }
 0x266   :  { %v280_v32 = vsel %vm279_vm4, %v339_v31, %v270_v24 }
 0x267   :  { %282 = vst.msk [vmem:[%s424_s5] sm:$0xff] %vm281_vm5, %v280_v32 }

</bundles_post_ra>
